<compile_context>
chip_gen: v6e
topology: v6e:2x2x1
jax: 0.10.0
libtpu: 0.0.40
codegen_flags: <defaults>
</compile_context>

<pallas_src>
import functools

import jax
import jax.numpy as jnp
from jax.experimental import pallas as pl
from jax.experimental.pallas import tpu as pltpu


def _make_logreg_kernel(i_size: int, o_size: int):
    """Build a kernel specialized on the (static) layer shape.

    Kernel ref shapes (transposed, samples on lanes):
      x_ref: [i_size, bn]  f32 VMEM
      w_ref: [i_size, o_size] f32 SMEM (scalars)
      b_ref: [o_size]        f32 SMEM (scalars)
      o_ref: [o_size, bn]  f32 VMEM
    """
    two_class = o_size == 2

    def kernel(x_ref, w_ref, b_ref, o_ref):
        if two_class:
            # softmax over 2 classes == sigmoid of the logit difference.
            # Only the difference is ever formed: K scalar-broadcast FMAs on
            # lane-dense rows, no second logit, no cross-lane traffic.
            d = x_ref[0:1, :] * (w_ref[0, 1] - w_ref[0, 0])
            for k in range(1, i_size):
                d = d + x_ref[k : k + 1, :] * (w_ref[k, 1] - w_ref[k, 0])
            d = d + (b_ref[1] - b_ref[0])

            # Exact sigmoid via a single EUP transcendental (tanh); no approx
            # reciprocal -> well within 1e-4 of the exact softmax.
            p1 = 0.5 * (1.0 + jnp.tanh(0.5 * d))          # [1, bn]

            # Two unmasked lane-dense row stores.
            o_ref[0:1, :] = 1.0 - p1
            o_ref[1:2, :] = p1
        else:
            # General small-o_size fallback: per-class scalar-broadcast MACs,
            # then a numerically stable softmax over the class (sublane) axis.
            # Exact division so probabilities sum to 1.
            # TODO(synk): for large i_size/o_size route W through VMEM and use
            # the MXU instead of this unrolled scalar loop.
            rows = []
            for o in range(o_size):
                r = x_ref[0:1, :] * w_ref[0, o]
                for k in range(1, i_size):
                    r = r + x_ref[k : k + 1, :] * w_ref[k, o]
                rows.append(r + b_ref[o])
            logits = jnp.concatenate(rows, axis=0)          # [o_size, bn]
            m = jnp.max(logits, axis=0, keepdims=True)
            e = jnp.exp(logits - m)
            o_ref[...] = (e / jnp.sum(e, axis=0, keepdims=True)).astype(o_ref.dtype)

    return kernel


@functools.partial(jax.jit, static_argnames=("block_cols",))
def logistic_regression_forward(x, weight, bias, *, block_cols: int = 16384):
    """x: [N, i_size] f32, weight: [i_size, o_size] f32, bias: [o_size] f32 -> [N, o_size]."""
    n, i_size = x.shape
    o_size = weight.shape[1]

    # Samples-on-lanes layout: [i_size, N].  (The source data exists in this
    # layout before the `.T` in the original script; the transpose here is a
    # cheap XLA op kept only to preserve the module's [N, i_size] interface.)
    xt = x.T

    # Lane block: multiple of 128.  Prefer >=2 grid steps when there is enough
    # work so v7x's two TensorCores both get tiles; at small N this is a single
    # 128-lane step (one ~0.35 us grid step).
    n_lanes = ((n + 127) // 128) * 128
    bn = max(128, (min(block_cols, n_lanes) // 128) * 128)
    if n_lanes >= 2 * 128 and n_lanes // bn < 2:
        bn = max(128, ((n_lanes // 2) // 128) * 128)
    n_pad = ((n + bn - 1) // bn) * bn
    if n_pad != n:
        # Zero-padded lane columns produce finite (uniform) probabilities and
        # are sliced off below.  Pad cost is negligible at small N; for huge N
        # pick block_cols so it divides N (or mask the last tile).
        xt = jnp.pad(xt, ((0, 0), (0, n_pad - n)))

    kernel = _make_logreg_kernel(i_size, o_size)
    out_t = pl.pallas_call(
        kernel,
        out_shape=jax.ShapeDtypeStruct((o_size, n_pad), jnp.float32),
        grid=(n_pad // bn,),
        in_specs=[
            pl.BlockSpec((i_size, bn), lambda i: (0, i)),          # x lane-tiles
            pl.BlockSpec(memory_space=pltpu.MemorySpace.SMEM),     # W as SMEM scalars
            pl.BlockSpec(memory_space=pltpu.MemorySpace.SMEM),     # b as SMEM scalars
        ],
        out_specs=pl.BlockSpec((o_size, bn), lambda i: (0, i)),
        compiler_params=pltpu.CompilerParams(
            dimension_semantics=("parallel",)),                    # shards lane-tiles on v7x's 2 TCs
    )(xt, weight, bias)

    return out_t[:, :n].T


if __name__ == "__main__":
    # Shapes implied by the original script: x = distrib.rsample().T -> [100, 2]
    N, I_SIZE, O_SIZE = 100, 2, 2

    key = jax.random.PRNGKey(0)
    kx, kw, kb = jax.random.split(key, 3)

    # Deterministic stand-in for the MultivariateNormal sample (identity covariance
    # => mean + standard normal), transposed to [100, 2] like the original script.
    mean_vec = jnp.concatenate([jnp.full((50,), 1.0), jnp.full((50,), 3.0)])
    mean = jnp.stack([mean_vec, mean_vec[::-1]], axis=0)                 # [2, 100]
    x = (mean + jax.random.normal(kx, (2, N), dtype=jnp.float32)).T      # [100, 2]

    # torch.Tensor(i, o) is uninitialized in the original; use a small deterministic
    # init so the forward pass is well-defined.
    weight = 0.1 * jax.random.normal(kw, (I_SIZE, O_SIZE), dtype=jnp.float32)
    bias = 0.1 * jax.random.normal(kb, (O_SIZE,), dtype=jnp.float32)

    out = logistic_regression_forward(x, weight, bias)
    out = jax.block_until_ready(out)

    # Sanity check against a plain-JAX reference.
    ref = jax.nn.softmax(x @ weight + bias, axis=-1)
    assert out.shape == (N, O_SIZE)
    assert jnp.allclose(out, ref, atol=1e-4, rtol=1e-4), float(jnp.max(jnp.abs(out - ref)))
    assert jnp.allclose(jnp.sum(out, axis=-1), 1.0, atol=1e-5)

    print("KERNEL_OK")
</pallas_src>

<mosaic_0001>
module attributes {stable_mosaic.version = 11 : i64} {
  func.func @kernel(%arg0: i32, %arg1: memref<2x128xf32, #tpu.memory_space<vmem>>, %arg2: memref<2x2xf32, #tpu.memory_space<smem>>, %arg3: memref<2xf32, #tpu.memory_space<smem>>, %arg4: memref<2x128xf32, #tpu.memory_space<vmem>>) attributes {dimension_semantics = [#tpu.dimension_semantics<parallel>], iteration_bounds = array<i64: 1>, scalar_prefetch = 0 : i64, scratch_operands = 0 : i64, tpu.core_type = #tpu.core_type<tc>, window_params = [{transform_indices = @transform_0, window_bounds = array<i64: 2, 128>}, {transform_indices = @transform_1, window_bounds = array<i64: 2, 2>}, {transform_indices = @transform_2, window_bounds = array<i64: 2>}, {transform_indices = @transform_3, window_bounds = array<i64: 2, 128>}]} {
    %c0 = arith.constant 0 : index
    %c0_0 = arith.constant 0 : index
    %0 = vector.load %arg1[%c0, %c0_0] : memref<2x128xf32, #tpu.memory_space<vmem>>, vector<1x128xf32>
    %c0_1 = arith.constant 0 : index
    %c1 = arith.constant 1 : index
    %1 = memref.load %arg2[%c0_1, %c1] : memref<2x2xf32, #tpu.memory_space<smem>>
    %c0_2 = arith.constant 0 : index
    %c0_3 = arith.constant 0 : index
    %2 = memref.load %arg2[%c0_2, %c0_3] : memref<2x2xf32, #tpu.memory_space<smem>>
    %3 = arith.subf %1, %2 : f32
    %4 = vector.broadcast %3 : f32 to vector<1x128xf32>
    %5 = arith.mulf %0, %4 : vector<1x128xf32>
    %c1_4 = arith.constant 1 : index
    %c0_5 = arith.constant 0 : index
    %6 = vector.load %arg1[%c1_4, %c0_5] : memref<2x128xf32, #tpu.memory_space<vmem>>, vector<1x128xf32>
    %c1_6 = arith.constant 1 : index
    %c1_7 = arith.constant 1 : index
    %7 = memref.load %arg2[%c1_6, %c1_7] : memref<2x2xf32, #tpu.memory_space<smem>>
    %c1_8 = arith.constant 1 : index
    %c0_9 = arith.constant 0 : index
    %8 = memref.load %arg2[%c1_8, %c0_9] : memref<2x2xf32, #tpu.memory_space<smem>>
    %9 = arith.subf %7, %8 : f32
    %10 = vector.broadcast %9 : f32 to vector<1x128xf32>
    %11 = arith.mulf %6, %10 : vector<1x128xf32>
    %12 = arith.addf %5, %11 : vector<1x128xf32>
    %c1_10 = arith.constant 1 : index
    %13 = memref.load %arg3[%c1_10] : memref<2xf32, #tpu.memory_space<smem>>
    %c0_11 = arith.constant 0 : index
    %14 = memref.load %arg3[%c0_11] : memref<2xf32, #tpu.memory_space<smem>>
    %15 = arith.subf %13, %14 : f32
    %16 = vector.broadcast %15 : f32 to vector<1x128xf32>
    %17 = arith.addf %12, %16 : vector<1x128xf32>
    %cst = arith.constant 5.000000e-01 : f32
    %18 = vector.broadcast %cst : f32 to vector<1x128xf32>
    %19 = arith.mulf %18, %17 : vector<1x128xf32>
    %20 = math.tanh %19 : vector<1x128xf32>
    %cst_12 = arith.constant 1.000000e+00 : f32
    %21 = vector.broadcast %cst_12 : f32 to vector<1x128xf32>
    %22 = arith.addf %21, %20 : vector<1x128xf32>
    %cst_13 = arith.constant 5.000000e-01 : f32
    %23 = vector.broadcast %cst_13 : f32 to vector<1x128xf32>
    %24 = arith.mulf %23, %22 : vector<1x128xf32>
    %cst_14 = arith.constant 1.000000e+00 : f32
    %25 = vector.broadcast %cst_14 : f32 to vector<1x128xf32>
    %26 = arith.subf %25, %24 : vector<1x128xf32>
    %c0_15 = arith.constant 0 : index
    %c0_16 = arith.constant 0 : index
    %27 = vector.load %arg4[%c0_15, %c0_16] : memref<2x128xf32, #tpu.memory_space<vmem>>, vector<1x128xf32>
    tpu.vector_store %arg4[%c0_15, %c0_16], %26 {strides = array<i32>} : memref<2x128xf32, #tpu.memory_space<vmem>>, vector<1x128xf32>,
    %c1_17 = arith.constant 1 : index
    %c0_18 = arith.constant 0 : index
    %28 = vector.load %arg4[%c1_17, %c0_18] : memref<2x128xf32, #tpu.memory_space<vmem>>, vector<1x128xf32>
    tpu.vector_store %arg4[%c1_17, %c0_18], %24 {strides = array<i32>} : memref<2x128xf32, #tpu.memory_space<vmem>>, vector<1x128xf32>,
    return
  }
  func.func @transform_0(%arg0: i32) -> (i32, i32) {
    %c0_i32 = arith.constant 0 : i32
    %c0_i32_0 = arith.constant 0 : i32
    return %c0_i32, %arg0 : i32, i32
  }
  func.func @transform_1(%arg0: i32) -> (i32, i32) {
    %c0_i32 = arith.constant 0 : i32
    %c0_i32_0 = arith.constant 0 : i32
    %c0_i32_1 = arith.constant 0 : i32
    return %c0_i32, %c0_i32_0 : i32, i32
  }
  func.func @transform_2(%arg0: i32) -> i32 {
    %c0_i32 = arith.constant 0 : i32
    %c0_i32_0 = arith.constant 0 : i32
    return %c0_i32 : i32
  }
  func.func @transform_3(%arg0: i32) -> (i32, i32) {
    %c0_i32 = arith.constant 0 : i32
    %c0_i32_0 = arith.constant 0 : i32
    return %c0_i32, %arg0 : i32, i32
  }
}

</mosaic_0001>

<bundles_post_ra>
// kernel: logistic_regression_forward.1
= control target key start
LH: loop header
LB: loop body
LE: loop exit
PB: predicated region body
PF: predicated region fallthrough
CT: control target
= control target key end

     0   :  { %8 = vsyncpa [#allocation3], 0  ;;  %s146_s0 = inlined_call_operand.vmem [shape: f32[2,128], index: 0, kind: input, shape index: {}]   ;;  %s147_s1 = inlined_call_operand.vmem [shape: f32[2,2], index: 1, kind: input, shape index: {}]   ;;  %s148_s2 = inlined_call_operand.vmem [shape: f32[2], index: 2, kind: input, shape index: {}]   ;;  %s149_s3 = inlined_call_operand.vmem [shape: f32[2,128], index: 3, kind: output, shape index: {}]  }
   0x1   :  { %s18_s14 = sshll.u32 %s147_s1, 4  ;;  %s19_s14 = int_to_ptr.vmem [resolvable:$true] %s18_s14 }
   0x2   :  { %9 = vsyncpa [#allocation5], 0  ;;  %s28_s17 = sshll.u32 %s148_s2, 4  ;;  %s78_s18 = scalar_lea.vmem %s19_s14, 32  ;;  %s29_s17 = int_to_ptr.vmem [resolvable:$true] %s28_s17 }
   0x3   :  { %p79_p0 = scmp.ne.s32.totalorder %s19_s14, %s78_s18  ;;  %p83_p1 = scmp.lt.s32.totalorder %s19_s14, %s19_s14 }
   0x4   :  { %p84_p2 = scmp.lt.s32.totalorder %s78_s18, %s78_s18 }
   0x6   :  { %p85_p3 = por %p84_p2, %p83_p1 }
   0x8   :  { %p86_p4 = pnand %p85_p3, %p79_p0 }
   0xa   :  { %89 = shalt.err (!%p86_p4)
}
   0xb   :  { %s106_s19 = smov [#allocation2]   ;;  %s90_s20 = scalar_lea.vmem %s29_s17, 16 }
   0xc   :  { %21 = dma.vmem_to_smem %s19_s14, 32, %s106_s19, [#allocation3]  }
   0xd   :  { %p91_p5 = scmp.ne.s32.totalorder %s29_s17, %s90_s20  ;;  %p95_p6 = scmp.lt.s32.totalorder %s29_s17, %s29_s17 }
   0xe   :  { %p96_p7 = scmp.lt.s32.totalorder %s90_s20, %s90_s20 }
  0x10   :  { %p97_p8 = por %p96_p7, %p95_p6 }
  0x12   :  { %p98_p9 = pnand %p97_p8, %p91_p5 }
  0x14   :  { %101 = shalt.err (!%p98_p9)
}
  0x15   :  { %s107_s1 = smov [#allocation4]  }
  0x16   :  { %31 = dma.vmem_to_smem %s29_s17, 16, %s107_s1, [#allocation5]  }
  0x17   :  { %102 = dma.done.wait [#allocation3], 32  }
  0x18   :  { %103 = vsyncadd [#allocation3], 4294967264 }
  0x19   :  { %104 = dma.done.wait [#allocation5], 16  }
  0x1a   :  { %105 = vsyncadd [#allocation5], 4294967280 }
  0x1b   :  { %38 = sfence }
  0x1c   :  { %s70_s2 = sld [smem:[#allocation2 + $0x1]]  ;;  %v39_v0 = vld [vmem:[%s146_s0] sm:$0x1]  ;;  %v45_v2 = vld [vmem:[%s146_s0 + $0x1] sm:$0x1] }
  0x1d   :  { %s41_s21 = sld [smem:[#allocation2]] }
  0x1e   :  { %s71_s22 = sld [smem:[#allocation2 + $0x81]] }
  0x1f   :  { %s72_s23 = sld [smem:[#allocation2 + $0x80]] }
  0x20   :  { %s73_s24 = sld [smem:[#allocation4 + $0x1]] }
  0x21   :  { %s53_s25 = sld [smem:[#allocation4]] }
  0x23   :  { %s42_s28 = ssub.f32 %s70_s2, %s41_s21 }
  0x25   :  { %v43_v1 = vstv %s42_s28  ;;  %s48_s4 = ssub.f32 %s71_s22, %s72_s23 }
  0x26   :  { %v44_v3 = vmul.f32 %v43_v1, %v39_v0 }
  0x27   :  { %v49_v4 = vstv %s48_s4  ;;  %s54_s5 = ssub.f32 %s73_s24, %s53_s25 }
  0x28   :  { %v50_v5 = vmul.f32 %v49_v4, %v45_v2 }
  0x29   :  { %v55_v6 = vstv %s54_s5 }
  0x2a   :  { %v51_v7 = vadd.f32 %v50_v5, %v44_v3 }
  0x2c   :  { %v56_v8 = vadd.f32 %v55_v6, %v51_v7 }
  0x2e   :  { %v57_v9 = vmul.f32 0.5, %v56_v8 }
  0x30   :  { %76 = vtanh.f32 %v57_v9 }
  0x3d   :  { %v77_v10 = vpop.eup %76 }
  0x3e   :  { %v59_v11 = vadd.f32 1.0, %v77_v10 }
  0x40   :  { %v60_v12 = vmul.f32 0.5, %v59_v11 }
  0x42   :  { %v61_v13 = vsub.f32 1.0, %v60_v12  ;;  %63 = vst [vmem:[%s149_s3 + $0x1] sm:$0x1] %v60_v12 }
  0x44   :  { %62 = vst [vmem:[%s149_s3] sm:$0x1] %v61_v13 }
  0x45   :  { %68 = vsyncpa [#allocation3], 1 }
  0x46   :  { %69 = vsyncpa [#allocation5], 1 }

</bundles_post_ra>
